<compile_context>
chip_gen: v5e
topology: v5e:2x2
jax: 0.10.0
libtpu: 0.0.40
codegen_flags: <defaults>
</compile_context>

<pallas_src>
import jax
import jax.numpy as jnp
from jax.experimental import pallas as pl
from jax.experimental.pallas import tpu as pltpu


def attention_pool_kernel(feats_ref, mask_ref, w_ref, out_ref):
    # feats_ref: (TB, T, D) native dtype; mask_ref: (TB, T, 1); w_ref: (1, 1, D) f32
    feats = feats_ref[...].astype(jnp.float32)          # cast in VMEM, not in HBM
    mask = mask_ref[...].astype(jnp.float32)            # (TB, T, 1)
    w = w_ref[...]                                       # (1, 1, D)

    # scores[b,t,0] = sum_d feats[b,t,d] * w[d]   (VPU mul + lane reduce).
    # T stays on the sublane axis so the softmax and pooling below need no
    # lane<->sublane relayout.
    scores = jnp.sum(feats * w, axis=-1, keepdims=True)  # (TB, T, 1)
    scores = scores - 10000.0 * mask

    # softmax over T (sublane axis)
    m = jnp.max(scores, axis=1, keepdims=True)            # (TB, 1, 1)
    e = jnp.exp(scores - m)                                # (TB, T, 1)
    denom = jnp.sum(e, axis=1, keepdims=True)              # (TB, 1, 1)
    # exact reciprocal (approx=True would use the idle EUP slot, but keep exact
    # for tight tolerance vs. the reference; the kernel is HBM-bound anyway).
    probs = e * pl.reciprocal(denom, approx=False)         # (TB, T, 1)

    # pooled[b,d] = sum_t probs[b,t] * feats[b,t,d]  (lane-broadcast mul + sublane reduce)
    pooled = jnp.sum(probs * feats, axis=1)                # (TB, D)
    out_ref[...] = pooled.astype(out_ref.dtype)


def _vmem_limit_bytes():
    """Generation-aware scoped-VMEM limit (<= 3/4 physical, capped at 64 MiB)."""
    cap = 64 * 1024 * 1024
    try:
        info = pltpu.get_tpu_info()
        cap = int(getattr(info, "vmem_capacity_bytes", cap))
    except Exception:
        pass
    return min(64 * 1024 * 1024, (cap * 3) // 4)   # v7x -> 48 MiB, v5e/v6e -> 64 MiB


def _choose_block_b(B, T, D, itemsize, vmem_limit, block_b=None):
    """Batch-tile size: big (amortize ~0.35us/step), VMEM-safe, megacore-friendly."""
    if block_b is not None:
        cap = max(1, int(block_b))
    else:
        # Conservative per-batch-row VMEM cost:
        #   2x double-buffered native-dtype feats + up to 2 tile-sized f32
        #   intermediates + 4 lane-sparse (T,1) softmax slabs (mask/scores/exp/probs).
        row_feats = T * D * itemsize
        row_f32 = T * D * 4
        row_soft = 4 * ((T + 7) // 8) * 8 * 128 * 4
        row_cost = 2 * row_feats + 2 * row_f32 + row_soft
        cap = max(8, vmem_limit // row_cost)

    if B <= 8:
        return B                                   # single block: full batch dim
    if B >= 16:
        cap = min(cap, max(8, (B + 1) // 2))       # >=2 blocks so v7x's 2 TCs both work
    if cap >= B:
        return B
    cap = max(8, (cap // 8) * 8)                   # sublane rule for mask/out blocks
    for tb in range(cap, 7, -8):                   # prefer a divisor of B: no ragged block
        if B % tb == 0:
            return tb
    return cap                                     # ragged last block: Pallas masks OOB rows


def attention_pool(temporal_feats, attention_mask, weight, bias=None,
                   block_b=None):
    """temporal_feats: (B, T, D); attention_mask: (B, T); weight: (D,1)/(1,D)/(D,);
    bias: scalar (unused inside the kernel: softmax over T is shift-invariant).
    Returns (B, D) in temporal_feats.dtype."""
    del bias  # mathematically a no-op before the T-softmax
    B, T, D = temporal_feats.shape
    out_dtype = temporal_feats.dtype
    itemsize = jnp.dtype(temporal_feats.dtype).itemsize

    # Tiny side inputs only are prepared on the host; feats streams untouched.
    w_row = jnp.asarray(weight, jnp.float32).reshape(1, 1, D)
    mask = attention_mask
    if mask.dtype == jnp.bool_:
        mask = mask.astype(jnp.float32)            # tiny (B*T); avoids bool block quirks
    mask = mask.reshape(B, T, 1)                   # T on sublanes to match the kernel

    vmem_limit = _vmem_limit_bytes()
    tb = _choose_block_b(B, T, D, itemsize, vmem_limit, block_b)
    n_blocks = pl.cdiv(B, tb)

    out = pl.pallas_call(
        attention_pool_kernel,
        out_shape=jax.ShapeDtypeStruct((B, D), out_dtype),
        grid_spec=pltpu.PrefetchScalarGridSpec(
            num_scalar_prefetch=0,
            grid=(n_blocks,),
            in_specs=[
                pl.BlockSpec((tb, T, D), lambda b: (b, 0, 0)),   # feats (native dtype)
                pl.BlockSpec((tb, T, 1), lambda b: (b, 0, 0)),   # mask
                pl.BlockSpec((1, 1, D), lambda b: (0, 0, 0)),    # weight row
            ],
            out_specs=pl.BlockSpec((tb, D), lambda b: (b, 0)),
        ),
        compiler_params=pltpu.CompilerParams(
            dimension_semantics=("parallel",),
            vmem_limit_bytes=vmem_limit,
        ),
    )(temporal_feats, mask, w_row)
    return out


def attention_pool_ref(temporal_feats, attention_mask, weight, bias):
    weight = jnp.asarray(weight, jnp.float32).reshape(-1, 1)          # (D, 1)
    scores = temporal_feats.astype(jnp.float32) @ weight + bias       # (B, T, 1)
    scores = scores - 10000.0 * attention_mask[..., None].astype(jnp.float32)
    probs = jax.nn.softmax(scores, axis=-2)                           # over T
    pooled = jnp.matmul(jnp.swapaxes(probs, -1, -2),
                        temporal_feats.astype(jnp.float32))           # (B, 1, D)
    return jnp.squeeze(pooled, axis=-2)


if __name__ == "__main__":
    key = jax.random.PRNGKey(0)
    k1, k2, k3, k4 = jax.random.split(key, 4)

    # --- small canonical test (B=2, T=8, D=32) ------------------------------
    B, T, D = 2, 8, 32
    temporal_feats = jax.random.normal(k1, (B, T, D), dtype=jnp.float32)
    attention_mask = (jax.random.uniform(k2, (B, T)) > 0.7).astype(jnp.float32)
    bound = 1.0 / jnp.sqrt(D)
    weight = jax.random.uniform(k3, (D, 1), minval=-bound, maxval=bound,
                                dtype=jnp.float32)
    bias = jax.random.uniform(k4, (), minval=-bound, maxval=bound,
                              dtype=jnp.float32)

    out = jax.block_until_ready(
        attention_pool(temporal_feats, attention_mask, weight, bias))
    ref = attention_pool_ref(temporal_feats, attention_mask, weight, bias)
    assert out.shape == (B, D)
    assert jnp.allclose(out, ref, atol=1e-5, rtol=1e-5), (
        f"max abs err {jnp.max(jnp.abs(out - ref))}")

    # --- multi-block test (exercises batch tiling; B=24 with TB=8 -> 3 steps)
    B2 = 24
    feats2 = jax.random.normal(k2, (B2, T, D), dtype=jnp.float32)
    mask2 = (jax.random.uniform(k1, (B2, T)) > 0.7).astype(jnp.float32)
    out2 = jax.block_until_ready(
        attention_pool(feats2, mask2, weight, bias, block_b=8))
    ref2 = attention_pool_ref(feats2, mask2, weight, bias)
    assert out2.shape == (B2, D)
    assert jnp.allclose(out2, ref2, atol=1e-5, rtol=1e-5), (
        f"max abs err {jnp.max(jnp.abs(out2 - ref2))}")

    print("KERNEL_OK")
</pallas_src>

<mosaic_0001>
module attributes {stable_mosaic.version = 11 : i64} {
  func.func @attention_pool_kernel(%arg0: i32, %arg1: memref<2x8x32xf32, #tpu.memory_space<vmem>>, %arg2: memref<2x8x1xf32, #tpu.memory_space<vmem>>, %arg3: memref<1x1x32xf32, #tpu.memory_space<vmem>>, %arg4: memref<2x32xf32, #tpu.memory_space<vmem>>) attributes {dimension_semantics = [#tpu.dimension_semantics<parallel>], iteration_bounds = array<i64: 1>, scalar_prefetch = 0 : i64, scratch_operands = 0 : i64, tpu.core_type = #tpu.core_type<tc>, window_params = [{transform_indices = @transform_0, window_bounds = array<i64: 2, 8, 32>}, {transform_indices = @transform_1, window_bounds = array<i64: 2, 8, 1>}, {pipeline_mode = #tpu.pipeline_mode<synchronous>, transform_indices = @transform_2, window_bounds = array<i64: 1, 1, 32>}, {transform_indices = @transform_3, window_bounds = array<i64: 2, 32>}]} {
    %c0 = arith.constant 0 : index
    %c0_0 = arith.constant 0 : index
    %c0_1 = arith.constant 0 : index
    %0 = vector.load %arg1[%c0, %c0_0, %c0_1] : memref<2x8x32xf32, #tpu.memory_space<vmem>>, vector<2x8x32xf32>
    %c0_2 = arith.constant 0 : index
    %c0_3 = arith.constant 0 : index
    %c0_4 = arith.constant 0 : index
    %1 = vector.load %arg2[%c0_2, %c0_3, %c0_4] : memref<2x8x1xf32, #tpu.memory_space<vmem>>, vector<2x8x1xf32>
    %c0_5 = arith.constant 0 : index
    %c0_6 = arith.constant 0 : index
    %c0_7 = arith.constant 0 : index
    %2 = vector.load %arg3[%c0_5, %c0_6, %c0_7] : memref<1x1x32xf32, #tpu.memory_space<vmem>>, vector<1x1x32xf32>
    %3 = vector.broadcast %2 : vector<1x1x32xf32> to vector<2x8x32xf32>
    %4 = arith.mulf %0, %3 : vector<2x8x32xf32>
    %cst = arith.constant dense<0.000000e+00> : vector<2x8xf32>
    %5 = vector.multi_reduction <add>, %4, %cst [2] : vector<2x8x32xf32> to vector<2x8xf32>
    %6 = vector.shape_cast %5 : vector<2x8xf32> to vector<2x8x1xf32>
    %cst_8 = arith.constant 1.000000e+04 : f32
    %7 = vector.broadcast %cst_8 : f32 to vector<2x8x1xf32>
    %8 = arith.mulf %7, %1 : vector<2x8x1xf32>
    %9 = arith.subf %6, %8 : vector<2x8x1xf32>
    %cst_9 = arith.constant dense<0xFF800000> : vector<2x1xf32>
    %10 = vector.multi_reduction <maximumf>, %9, %cst_9 [1] : vector<2x8x1xf32> to vector<2x1xf32>
    %11 = vector.shape_cast %10 : vector<2x1xf32> to vector<2x1x1xf32>
    %12 = vector.broadcast %11 : vector<2x1x1xf32> to vector<2x8x1xf32>
    %13 = arith.subf %9, %12 : vector<2x8x1xf32>
    %14 = math.exp %13 : vector<2x8x1xf32>
    %cst_10 = arith.constant dense<0.000000e+00> : vector<2x1xf32>
    %15 = vector.multi_reduction <add>, %14, %cst_10 [1] : vector<2x8x1xf32> to vector<2x1xf32>
    %16 = vector.shape_cast %15 : vector<2x1xf32> to vector<2x1x1xf32>
    %17 = tpu.reciprocal %16 : vector<2x1x1xf32> -> vector<2x1x1xf32>
    %18 = vector.broadcast %17 : vector<2x1x1xf32> to vector<2x8x1xf32>
    %19 = arith.mulf %14, %18 : vector<2x8x1xf32>
    %20 = vector.broadcast %19 : vector<2x8x1xf32> to vector<2x8x32xf32>
    %21 = arith.mulf %20, %0 : vector<2x8x32xf32>
    %cst_11 = arith.constant dense<0.000000e+00> : vector<2x32xf32>
    %22 = vector.multi_reduction <add>, %21, %cst_11 [1] : vector<2x8x32xf32> to vector<2x32xf32>
    %c0_12 = arith.constant 0 : index
    %c0_13 = arith.constant 0 : index
    %23 = vector.load %arg4[%c0_12, %c0_13] : memref<2x32xf32, #tpu.memory_space<vmem>>, vector<2x32xf32>
    tpu.vector_store %arg4[%c0_12, %c0_13], %22 {strides = array<i32>} : memref<2x32xf32, #tpu.memory_space<vmem>>, vector<2x32xf32>,
    return
  }
  func.func @transform_0(%arg0: i32) -> (i32, i32, i32) {
    %c0_i32 = arith.constant 0 : i32
    %c0_i32_0 = arith.constant 0 : i32
    %c0_i32_1 = arith.constant 0 : i32
    return %arg0, %c0_i32, %c0_i32_0 : i32, i32, i32
  }
  func.func @transform_1(%arg0: i32) -> (i32, i32, i32) {
    %c0_i32 = arith.constant 0 : i32
    %c0_i32_0 = arith.constant 0 : i32
    %c0_i32_1 = arith.constant 0 : i32
    return %arg0, %c0_i32, %c0_i32_0 : i32, i32, i32
  }
  func.func @transform_2(%arg0: i32) -> (i32, i32, i32) {
    %c0_i32 = arith.constant 0 : i32
    %c0_i32_0 = arith.constant 0 : i32
    %c0_i32_1 = arith.constant 0 : i32
    %c0_i32_2 = arith.constant 0 : i32
    return %c0_i32, %c0_i32_0, %c0_i32_1 : i32, i32, i32
  }
  func.func @transform_3(%arg0: i32) -> (i32, i32) {
    %c0_i32 = arith.constant 0 : i32
    %c0_i32_0 = arith.constant 0 : i32
    return %arg0, %c0_i32 : i32, i32
  }
}

</mosaic_0001>

<bundles_post_ra>
// kernel: tpu_custom_call.1
= control target key start
LH: loop header
LB: loop body
LE: loop exit
PB: predicated region body
PF: predicated region fallthrough
CT: control target
= control target key end

     0   :  { %vm25_vm0 = vcmask 261120   ;;  %s245_s0 = inlined_call_operand.vmem [shape: f32[2,8,32], index: 0, kind: input, shape index: {}]   ;;  %s246_s1 = inlined_call_operand.vmem [shape: f32[2,8,1], index: 1, kind: input, shape index: {}]   ;;  %s247_s2 = inlined_call_operand.vmem [shape: f32[1,1,32], index: 2, kind: input, shape index: {}]   ;;  %s248_s3 = inlined_call_operand.hbm [shape: f32[2,32], index: 3, kind: output, shape index: {}]  }
   0x1   :  { %v214_v0 = vld [vmem:[%s245_s0] sm:$0xff] }
   0x2   :  { %v154_v1 = vld [vmem:[%s247_s2] ss:$0 sm:$0xff] }
   0x3   :  { %8 = vsyncpa [#allocation3], 0  ;;  %v23_v2 = vmul.f32 %v154_v1, %v214_v0  ;;  %v223_v3 = vld [vmem:[%s245_s0 + $0x8] sm:$0xff]  ;;  %v17_v7 = vld [vmem:[%s246_s1] sm:$0xff]  ;;  %vm36_vm1 = vcmask 7168   ;;  %v189_v27 = vmov 0  }
   0x4   :  { %v24_v5 = vmul.f32 %v154_v1, %v223_v3  ;;  %v32_v8 = vmul.f32 10000.0, %v17_v7  ;;  %v18_v11 = vld [vmem:[%s246_s1 + $0x8] sm:$0xff]  ;;  %152 = vset.pattern.permute.xlu1 %v189_v27  ;;  %153 = vset.pattern.permute.xlu0 %v189_v27  ;;  %s190_s0 = smov [#allocation2]   ;;  %s141_s23 = sshll.u32 %s248_s3, 4  ;;  %vm129_vm10 = vcmask 1041409   ;;  %vm132_vm11 = vcmask 254976   ;;  %s142_s23 = int_to_ptr.hbm [resolvable:$true] %s141_s23 }
   0x5   :  { %v26_v4 = vsel %vm25_vm0, %v23_v2, 0.0  ;;  %v33_v14 = vmul.f32 10000.0, %v18_v11  ;;  %s139_s1 = sshll.u32 %s190_s0, 4  ;;  %s140_s1 = int_to_ptr.vmem [resolvable:$true] %s139_s1 }
   0x6   :  { %27 = vadd.xlane.f32.xlu0 %v26_v4  ;;  %v29_v6 = vsel %vm25_vm0, %v24_v5, 0.0 }
   0xe   :  { %30 = vadd.xlane.f32.xlu0 %v29_v6 }
  0x79   :  { %v28_v9 = vpop.xlane.xlu0 %27 }
  0x7a   :  { %v34_v10 = vsub.f32 %v28_v9, %v32_v8 }
  0x7c   :  { %v37_v12 = vsel %vm36_vm1, %v34_v10, -inf }
  0x7d   :  { %v38_v13 = vrot.slane %v37_v12, 4 }
  0x7f   :  { %v39_v15 = vmax.f32 %v37_v12, %v38_v13 }
  0x81   :  { %v40_v16 = vrot.slane %v39_v15, 2  ;;  %v31_v17 = vpop.xlane.xlu0 %30 }
  0x82   :  { %v35_v18 = vsub.f32 %v31_v17, %v33_v14 }
  0x83   :  { %v41_v19 = vmax.f32 %v39_v15, %v40_v16 }
  0x84   :  { %v44_v20 = vsel %vm36_vm1, %v35_v18, -inf }
  0x85   :  { %v42_v21 = vrot.slane %v41_v19, 1  ;;  %v45_v22 = vrot.slane %v44_v20, 4 }
  0x87   :  { %v43_v23 = vmax.f32 %v41_v19, %v42_v21  ;;  %v46_v24 = vmax.f32 %v44_v20, %v45_v22 }
  0x89   :  { %v51_v25 = vsub.f32 %v34_v10, %v43_v23  ;;  %v47_v26 = vrot.slane %v46_v24, 2 }
  0x8b   :  { %v53_v28 = vmul.f32 1.442695, %v51_v25  ;;  %v48_v29 = vmax.f32 %v46_v24, %v47_v26 }
  0x8d   :  { %155 = vpow2.f32 %v53_v28  ;;  %v49_v30 = vrot.slane %v48_v29, 1 }
  0x8f   :  { %v50_v31 = vmax.f32 %v48_v29, %v49_v30 }
  0x91   :  { %v52_v32 = vsub.f32 %v35_v18, %v50_v31 }
  0x93   :  { %v156_v33 = vpop.eup %155  ;;  %v55_v34 = vmul.f32 1.442695, %v52_v32 }
  0x94   :  { %v57_v35 = vsel %vm36_vm1, %v156_v33, 0.0 }
  0x95   :  { %v58_v36 = vrot.slane %v57_v35, 4  ;;  %157 = vpow2.f32 %v55_v34 }
  0x97   :  { %v59_v37 = vadd.f32 %v58_v36, %v57_v35 }
  0x99   :  { %v60_v38 = vrot.slane %v59_v37, 2 }
  0x9b   :  { %v158_v39 = vpop.eup %157  ;;  %v61_v40 = vadd.f32 %v60_v38, %v59_v37 }
  0x9c   :  { %v64_v41 = vsel %vm36_vm1, %v158_v39, 0.0 }
  0x9d   :  { %v62_v42 = vrot.slane %v61_v40, 1  ;;  %v65_v43 = vrot.slane %v64_v41, 4 }
  0x9f   :  { %v63_v44 = vadd.f32 %v62_v42, %v61_v40  ;;  %v66_v45 = vadd.f32 %v65_v43, %v64_v41 }
  0xa1   :  { %159 = vrcp.f32 %v63_v44  ;;  %v67_v46 = vrot.slane %v66_v45, 2  ;;  %v82_v53 = vand.u32 2147483648, %v63_v44  ;;  %v80_v55 = vand.u32 2147483647, %v63_v44 }
  0xa2   :  { %vm76_vm3 = vweird.f32 %v63_v44 }
  0xa3   :  { %v68_v47 = vadd.f32 %v67_v46, %v66_v45  ;;  %v83_v58 = vor.u32 1.1754944e-38, %v82_v53  ;;  %vm81_vm5 = vcmp.eq.f32.partialorder %v80_v55, 8.507059e+37 }
  0xa5   :  { %v69_v48 = vrot.slane %v68_v47, 1 }
  0xa7   :  { %v160_v49 = vpop.eup %159  ;;  %v70_v50 = vadd.f32 %v69_v48, %v68_v47 }
  0xa8   :  { %v72_v51 = vmul.f32 %v160_v49, %v63_v44  ;;  %vm77_vm2 = vweird.f32 %v160_v49 }
  0xa9   :  { %161 = vrcp.f32 %v70_v50  ;;  %vm78_vm4 = vmor %vm76_vm3, %vm77_vm2  ;;  %v96_v1 = vand.u32 2147483648, %v70_v50  ;;  %v94_v4 = vand.u32 2147483647, %v70_v50  ;;  %vm90_vm7 = vweird.f32 %v70_v50 }
  0xaa   :  { %v73_v52 = vsub.f32 1.0, %v72_v51 }
  0xab   :  { %v97_v6 = vor.u32 1.1754944e-38, %v96_v1  ;;  %vm95_vm9 = vcmp.eq.f32.partialorder %v94_v4, 8.507059e+37 }
  0xac   :  { %v74_v54 = vmul.f32 %v160_v49, %v73_v52 }
  0xae   :  { %v75_v56 = vadd.f32 %v160_v49, %v74_v54 }
  0xaf   :  { %v162_v57 = vpop.eup %161 }
  0xb0   :  { %v79_v59 = vsel %vm78_vm4, %v160_v49, %v75_v56  ;;  %v86_v60 = vmul.f32 %v162_v57, %v70_v50  ;;  %vm91_vm6 = vweird.f32 %v162_v57 }
  0xb1   :  { %v84_v61 = vsel %vm81_vm5, %v83_v58, %v79_v59  ;;  %vm92_vm8 = vmor %vm90_vm7, %vm91_vm6 }
  0xb2   :  { %v99_v62 = vmul.f32 %v156_v33, %v84_v61  ;;  %v87_v63 = vsub.f32 1.0, %v86_v60 }
  0xb4   :  { %103 = vperm.xlu1 %152, %v99_v62   ;;  %v88_v2 = vmul.f32 %v162_v57, %v87_v63 }
  0xb6   :  { %v89_v5 = vadd.f32 %v162_v57, %v88_v2 }
  0xb8   :  { %v93_v7 = vsel %vm92_vm8, %v162_v57, %v89_v5 }
  0xb9   :  { %v98_v8 = vsel %vm95_vm9, %v97_v6, %v93_v7 }
  0xba   :  { %v100_v9 = vmul.f32 %v158_v39, %v98_v8 }
  0xbc   :  { %108 = vperm.xlu1 %152, %v100_v9  }
 0x126   :  { %v104_v10 = vpop.permute.xlu1 %103 }
 0x127   :  { %v111_v11 = vmul.f32 %v104_v10, %v214_v0 }
 0x129   :  { %v113_v12 = vsel %vm25_vm0, %v111_v11, 0.0 }
 0x12a   :  { %v114_v13 = vrot.slane %v113_v12, 4 }
 0x12c   :  { %v115_v14 = vadd.f32 %v114_v13, %v113_v12 }
 0x12e   :  { %v109_v15 = vpop.permute.xlu1 %108  ;;  %v116_v17 = vrot.slane %v115_v14, 2 }
 0x12f   :  { %v112_v16 = vmul.f32 %v109_v15, %v223_v3 }
 0x130   :  { %v117_v20 = vadd.f32 %v116_v17, %v115_v14 }
 0x131   :  { %v120_v18 = vsel %vm25_vm0, %v112_v16, 0.0 }
 0x132   :  { %v121_v19 = vrot.slane %v120_v18, 4  ;;  %v118_v23 = vrot.slane %v117_v20, 1 }
 0x134   :  { %v122_v21 = vadd.f32 %v121_v19, %v120_v18  ;;  %v119_v0 = vadd.f32 %v118_v23, %v117_v20 }
 0x136   :  { %v123_v22 = vrot.slane %v122_v21, 2 }
 0x138   :  { %v124_v24 = vadd.f32 %v123_v22, %v122_v21 }
 0x13a   :  { %v125_v25 = vrot.slane %v124_v24, 1 }
 0x13c   :  { %v126_v26 = vadd.f32 %v125_v25, %v124_v24 }
 0x13e   :  { %v130_v3 = vsel %vm129_vm10, %v126_v26, %v119_v0 }
 0x13f   :  { %133 = vst.msk [vmem:[#allocation2] sm:$0x3] %vm132_vm11, %v130_v3 }
 0x140   :  { %144 = dma.vmem_to_hbm [thread:$0]  %s140_s1, 32, %s142_s23, [#allocation3]  }
 0x141   :  { %187 = dma.done.wait [#allocation3], 32  }
 0x142   :  { %188 = vsyncadd [#allocation3], 4294967264 }
 0x143   :  { %149 = vsyncpa [#allocation3], 1 }

</bundles_post_ra>
